<compile_context>
chip_gen: v7x
topology: tpu7x:2x2x1
jax: 0.10.0
libtpu: 0.0.40
codegen_flags: <defaults>
</compile_context>

<pallas_src>
import functools

import jax
import jax.numpy as jnp
from jax.experimental import pallas as pl
from jax.experimental.pallas import tpu as pltpu


def _choose_tm(m, target=512):
    """Pick the M-tile: full M for small maps, else a large 8-aligned tile."""
    return m if m <= target else target


# ---------------------------------------------------------------------------
# Kernel 1: conv1 as (im2col-matmul) X @ W + b, ReLU, bf16 out
# ---------------------------------------------------------------------------
def _conv_mm_relu_kernel(x_ref, w_ref, b_ref, o_ref):
    y = jnp.dot(x_ref[...], w_ref[...], preferred_element_type=jnp.float32)
    y = jnp.maximum(y + b_ref[...], 0.0)
    o_ref[...] = y.astype(o_ref.dtype)


def conv_matmul_relu(x, w, b, *, out_dtype=jnp.bfloat16, tm=512):
    M, K = x.shape
    _, Nc = w.shape
    tm = _choose_tm(M, tm)
    return pl.pallas_call(
        _conv_mm_relu_kernel,
        out_shape=jax.ShapeDtypeStruct((M, Nc), out_dtype),
        grid=(pl.cdiv(M, tm),),
        in_specs=[
            pl.BlockSpec((tm, K), lambda i: (i, 0)),
            pl.BlockSpec((K, Nc), lambda i: (0, 0)),
            pl.BlockSpec((1, Nc), lambda i: (0, 0)),
        ],
        out_specs=pl.BlockSpec((tm, Nc), lambda i: (i, 0)),
        compiler_params=pltpu.CompilerParams(dimension_semantics=("parallel",)),
    )(x, w, b)


# ---------------------------------------------------------------------------
# Kernel 2 (fused): conv2 matmul + ReLU + cls|reg head + Gaussian decode
#                   + score threshold, single lane-dense packed output.
# Packed output columns: [scores(0..nc-1), cx, cy, w, l, cos, sin, best, valid, pad...]
# ---------------------------------------------------------------------------
def _conv2_head_kernel(params_ref, cols_ref, w2_ref, b2_ref, wh_ref, bh_ref,
                       out_ref, *, fh, fw, out_size_factor, num_classes, out_w):
    x_min = params_ref[0]
    y_min = params_ref[1]
    x_res = params_ref[2]
    y_res = params_ref[3]
    thr = params_ref[4]

    # conv2 (3x3 stride-1 as im2col matmul) + bias + ReLU, f32 accumulation.
    feat = jnp.dot(cols_ref[...], w2_ref[...], preferred_element_type=jnp.float32)
    feat = jnp.maximum(feat + b2_ref[...], 0.0)

    # Fused cls|reg 1x1 heads: one MXU push for both.
    head = jnp.dot(feat, wh_ref[...], preferred_element_type=jnp.float32)
    head = head + bh_ref[...]
    scores = jax.nn.sigmoid(head[:, :num_classes])
    reg = head[:, num_classes:num_classes + 6]

    tm = feat.shape[0]
    m0 = pl.program_id(0) * tm
    m_idx = m0 + jax.lax.broadcasted_iota(jnp.int32, (tm, 1), 0)
    col = (m_idx % fw).astype(jnp.float32)
    row = ((m_idx // fw) % fh).astype(jnp.float32)

    dx = reg[:, 0:1]
    dy = reg[:, 1:2]
    bw = jnp.exp(reg[:, 2:3])
    bl = jnp.exp(reg[:, 3:4])
    cos_y = reg[:, 4:5]
    sin_y = reg[:, 5:6]

    cx = (col + dx) * (x_res * out_size_factor) + x_min
    cy = (row + dy) * (y_res * out_size_factor) + y_min

    best = jnp.max(scores, axis=-1, keepdims=True)
    valid = (best > thr).astype(jnp.float32)

    pieces = [scores, cx, cy, bw, bl, cos_y, sin_y, best, valid]
    pad_w = out_w - (num_classes + 8)
    if pad_w > 0:
        pieces.append(jnp.zeros((tm, pad_w), jnp.float32))
    packed = jnp.concatenate(pieces, axis=-1)
    out_ref[...] = packed.astype(out_ref.dtype)  # single lane-dense store


def conv2_gaussian_head(cols2, w2, b2, w_head, b_head, decode_params, *, fh, fw,
                        out_size_factor, num_classes, tm=512):
    M, K = cols2.shape
    C = w2.shape[1]
    NH = w_head.shape[1]
    out_w = ((num_classes + 8 + 7) // 8) * 8  # pack width (>= nc + 8), 8-aligned
    tm = _choose_tm(M, tm)
    kernel = functools.partial(
        _conv2_head_kernel, fh=fh, fw=fw, out_size_factor=out_size_factor,
        num_classes=num_classes, out_w=out_w)
    return pl.pallas_call(
        kernel,
        out_shape=jax.ShapeDtypeStruct((M, out_w), jnp.float32),
        grid=(pl.cdiv(M, tm),),
        in_specs=[
            pl.BlockSpec(memory_space=pltpu.MemorySpace.SMEM),   # decode params
            pl.BlockSpec((tm, K), lambda i: (i, 0)),             # im2col cols (bf16)
            pl.BlockSpec((K, C), lambda i: (0, 0)),              # conv2 weight (bf16)
            pl.BlockSpec((1, C), lambda i: (0, 0)),              # conv2 bias
            pl.BlockSpec((C, NH), lambda i: (0, 0)),             # cls|reg fused weight
            pl.BlockSpec((1, NH), lambda i: (0, 0)),             # cls|reg fused bias
        ],
        out_specs=pl.BlockSpec((tm, out_w), lambda i: (i, 0)),
        compiler_params=pltpu.CompilerParams(dimension_semantics=("parallel",)),
    )(decode_params, cols2, w2, b2, w_head, b_head)


# ---------------------------------------------------------------------------
# Glue: im2col, parameter construction, full forward
# ---------------------------------------------------------------------------
def im2col_3x3(x_nhwc, stride):
    """x_nhwc: [N,H,W,C], padding=1, 3x3 kernel. Returns ([N*Ho*Wo, 9*C], (N,Ho,Wo))."""
    N, H, W, C = x_nhwc.shape
    xp = jnp.pad(x_nhwc, ((0, 0), (1, 1), (1, 1), (0, 0)))
    Ho, Wo = H // stride, W // stride
    patches = []
    for di in range(3):
        for dj in range(3):
            patches.append(xp[:, di:di + H:stride, dj:dj + W:stride, :])
    cols = jnp.concatenate(patches, axis=-1)          # [N, Ho, Wo, 9*C]
    return cols.reshape(N * Ho * Wo, 9 * C), (N, Ho, Wo)


def init_params(key, c_in=4, c_mid=32, backbone_out_dim=32, num_classes=4):
    ks = jax.random.split(key, 8)
    scale = 0.05
    p = {
        "w1": scale * jax.random.normal(ks[0], (9 * c_in, c_mid), jnp.float32),
        "b1": jnp.zeros((1, c_mid), jnp.float32),
        "w2": scale * jax.random.normal(ks[1], (9 * c_mid, backbone_out_dim), jnp.float32),
        "b2": jnp.zeros((1, backbone_out_dim), jnp.float32),
        "w_cls": scale * jax.random.normal(ks[2], (backbone_out_dim, num_classes), jnp.float32),
        "b_cls": jnp.zeros((1, num_classes), jnp.float32),
        "w_reg": scale * jax.random.normal(ks[3], (backbone_out_dim, 6), jnp.float32),
        "b_reg": jnp.zeros((1, 6), jnp.float32),
    }
    return p


def torchscript_model_forward(params, x_nchw, x_min, y_min, x_res, y_res,
                              score_threshold, *, out_size_factor=2.0,
                              num_classes=4):
    # PyTorch conv inputs are NCHW; convert to NHWC (bf16) for the TPU kernels.
    x = jnp.transpose(x_nchw, (0, 2, 3, 1)).astype(jnp.bfloat16)

    # Backbone stage 1: conv3x3 stride-2 + ReLU (bf16 feature map out).
    cols1, (N, H1, W1) = im2col_3x3(x, stride=2)
    f1 = conv_matmul_relu(cols1, params["w1"].astype(jnp.bfloat16), params["b1"],
                          out_dtype=jnp.bfloat16, tm=512)
    f1 = f1.reshape(N, H1, W1, -1)

    # Backbone stage 2 + header, fused in one Pallas kernel.
    # TODO(synk): conv2's im2col is still materialized by XLA; an in-kernel halo
    #             conv (manual DMA of (tr+2)-row slabs) would cut its HBM reads
    #             a further ~8x at real PIXOR BEV sizes.
    cols2, (N, H2, W2) = im2col_3x3(f1, stride=1)

    w_head = jnp.concatenate([params["w_cls"], params["w_reg"]], axis=1)  # (C, nc+6)
    b_head = jnp.concatenate([params["b_cls"], params["b_reg"]], axis=1)  # (1, nc+6)
    decode_params = jnp.array([x_min, y_min, x_res, y_res, score_threshold],
                              dtype=jnp.float32)

    packed = conv2_gaussian_head(
        cols2, params["w2"].astype(jnp.bfloat16), params["b2"], w_head, b_head,
        decode_params, fh=H2, fw=W2, out_size_factor=out_size_factor,
        num_classes=num_classes, tm=512)

    packed = packed.reshape(N, H2, W2, -1)
    scores = packed[..., :num_classes]
    cx = packed[..., num_classes + 0]
    cy = packed[..., num_classes + 1]
    bw = packed[..., num_classes + 2]
    bl = packed[..., num_classes + 3]
    cos_y = packed[..., num_classes + 4]
    sin_y = packed[..., num_classes + 5]
    best = packed[..., num_classes + 6]
    valid = packed[..., num_classes + 7]

    # yaw from (cos, sin) — glue (atan2 kept outside the kernel).
    yaw = jnp.arctan2(sin_y, cos_y)
    pred = {
        "scores": scores,
        "boxes": jnp.stack([cx, cy, bw, bl, yaw, best, valid], axis=-1),
    }
    return pred


if __name__ == "__main__":
    key = jax.random.PRNGKey(0)
    k_x, k_p = jax.random.split(key)
    x = jax.random.normal(k_x, (2, 4, 16, 16), jnp.float32)  # NCHW, like PyTorch
    params = init_params(k_p)

    pred = torchscript_model_forward(
        params, x,
        x_min=-40.0, y_min=0.0, x_res=0.1, y_res=0.1,
        score_threshold=0.5)
    jax.block_until_ready(pred)

    assert pred["scores"].shape == (2, 8, 8, 4)
    assert pred["boxes"].shape == (2, 8, 8, 7)
    print("KERNEL_OK")
</pallas_src>

<mosaic_0001>
module attributes {stable_mosaic.version = 11 : i64} {
  func.func @_conv_mm_relu_kernel(%arg0: i32, %arg1: memref<128x36xbf16, #tpu.memory_space<vmem>>, %arg2: memref<36x32xbf16, #tpu.memory_space<vmem>>, %arg3: memref<1x32xf32, #tpu.memory_space<vmem>>, %arg4: memref<128x32xbf16, #tpu.memory_space<vmem>>) attributes {dimension_semantics = [#tpu.dimension_semantics<parallel>], iteration_bounds = array<i64: 1>, scalar_prefetch = 0 : i64, scratch_operands = 0 : i64, tpu.core_type = #tpu.core_type<tc>, window_params = [{transform_indices = @transform_0, window_bounds = array<i64: 128, 36>}, {pipeline_mode = #tpu.pipeline_mode<synchronous>, transform_indices = @transform_1, window_bounds = array<i64: 36, 32>}, {pipeline_mode = #tpu.pipeline_mode<synchronous>, transform_indices = @transform_2, window_bounds = array<i64: 1, 32>}, {transform_indices = @transform_3, window_bounds = array<i64: 128, 32>}]} {
    %c0 = arith.constant 0 : index
    %c0_0 = arith.constant 0 : index
    %0 = vector.load %arg1[%c0, %c0_0] : memref<128x36xbf16, #tpu.memory_space<vmem>>, vector<128x36xbf16>
    %c0_1 = arith.constant 0 : index
    %c0_2 = arith.constant 0 : index
    %1 = vector.load %arg2[%c0_1, %c0_2] : memref<36x32xbf16, #tpu.memory_space<vmem>>, vector<36x32xbf16>
    %cst = arith.constant dense<0.000000e+00> : vector<128x32xf32>
    %2 = tpu.matmul %0, %1, %cst {dimension_numbers = #tpu.dot_dimension_numbers<[1], [0], [0], [1], [0, 0, 1, 1], [], []>} : vector<128x36xbf16>, vector<36x32xbf16>, vector<128x32xf32> -> vector<128x32xf32>
    %c0_3 = arith.constant 0 : index
    %c0_4 = arith.constant 0 : index
    %3 = vector.load %arg3[%c0_3, %c0_4] : memref<1x32xf32, #tpu.memory_space<vmem>>, vector<1x32xf32>
    %4 = vector.broadcast %3 : vector<1x32xf32> to vector<128x32xf32>
    %5 = arith.addf %2, %4 : vector<128x32xf32>
    %cst_5 = arith.constant 0.000000e+00 : f32
    %6 = vector.broadcast %cst_5 : f32 to vector<128x32xf32>
    %7 = arith.maximumf %5, %6 : vector<128x32xf32>
    %8 = arith.truncf %7 : vector<128x32xf32> to vector<128x32xbf16>
    %c0_6 = arith.constant 0 : index
    %c0_7 = arith.constant 0 : index
    %9 = vector.load %arg4[%c0_6, %c0_7] : memref<128x32xbf16, #tpu.memory_space<vmem>>, vector<128x32xbf16>
    tpu.vector_store %arg4[%c0_6, %c0_7], %8 {strides = array<i32>} : memref<128x32xbf16, #tpu.memory_space<vmem>>, vector<128x32xbf16>,
    return
  }
  func.func @transform_0(%arg0: i32) -> (i32, i32) {
    %c0_i32 = arith.constant 0 : i32
    %c0_i32_0 = arith.constant 0 : i32
    return %arg0, %c0_i32 : i32, i32
  }
  func.func @transform_1(%arg0: i32) -> (i32, i32) {
    %c0_i32 = arith.constant 0 : i32
    %c0_i32_0 = arith.constant 0 : i32
    %c0_i32_1 = arith.constant 0 : i32
    return %c0_i32, %c0_i32_0 : i32, i32
  }
  func.func @transform_2(%arg0: i32) -> (i32, i32) {
    %c0_i32 = arith.constant 0 : i32
    %c0_i32_0 = arith.constant 0 : i32
    %c0_i32_1 = arith.constant 0 : i32
    return %c0_i32, %c0_i32_0 : i32, i32
  }
  func.func @transform_3(%arg0: i32) -> (i32, i32) {
    %c0_i32 = arith.constant 0 : i32
    %c0_i32_0 = arith.constant 0 : i32
    return %arg0, %c0_i32 : i32, i32
  }
}

</mosaic_0001>

<bundles_post_ra>
// kernel: tpu_custom_call.1
= control target key start
LH: loop header
LB: loop body
LE: loop exit
PB: predicated region body
PF: predicated region fallthrough
CT: control target
= control target key end

     0   :  { %vm98_vm0 = vcmask 293888   ;;  %vm123_vm1 = vcmask 1041408   ;;  %vm304_vm2 = vcmask 257024   ;;  %s557_s1 = inlined_call_operand.vmem [shape: bf16[36,32], index: 1, kind: input, shape index: {}]   ;;  %s558_s0 = inlined_call_operand.vmem [shape: bf16[128,36], index: 0, kind: input, shape index: {}]   ;;  %s559_s2 = inlined_call_operand.vmem [shape: f32[1,32], index: 2, kind: input, shape index: {}]   ;;  %s560_s3 = inlined_call_operand.vmem [shape: bf16[128,32], index: 3, kind: output, shape index: {}]  }
   0x1   :  { %v418_v0 = vld [vmem:[%s557_s1] sm:$0xff]   ;;  %v419_v1 = vld [vmem:[%s557_s1 + $0x8] sm:$0xff]   ;;  %v420_v2 = vld [vmem:[%s557_s1 + $0x10] ss:$0 sps:$4 sm:$0x33]  }
   0x2   :  { %388 = vmatprep.subr.bf16.mxu0 %v418_v0  ;;  %410 = vmatprep.subr.bf16.mxu1 %v418_v0  ;;  %v421_v3 = vld [vmem:[%s558_s0] sm:$0xff]   ;;  %v125_v5 = vsel %vm123_vm1, %v420_v2, 0  ;;  %v423_v6 = vld [vmem:[%s558_s0 + $0x8] sm:$0xff]   ;;  %v425_v8 = vld [vmem:[%s558_s0 + $0x10] sm:$0xff]  }
   0x3   :  { %389 = vmatpush3.bf16.msra.mxu0 %v418_v0  ;;  %413 = vmatpush3.bf16.msra.mxu1 %v418_v0  ;;  %v422_v4 = vld [vmem:[%s558_s0 + $0x20] sm:$0xff]   ;;  %v424_v7 = vld [vmem:[%s558_s0 + $0x28] sm:$0xff]   ;;  %v426_v9 = vld [vmem:[%s558_s0 + $0x30] sm:$0xff]  }
   0x4   :  { %390 = vmatprep.subr.bf16.mxu0 %v419_v1  ;;  %411 = vmatprep.subr.bf16.mxu1 %v419_v1  ;;  %v427_v10 = vld [vmem:[%s558_s0 + $0x18] sm:$0xff]   ;;  %v325_v12 = vld [vmem:[%s559_s2] ss:$0 sm:$0xff] }
   0x5   :  { %394 = vmatprep.mubr.msk.bf16.mxu0 %vm98_vm0, %v421_v3  ;;  %402 = vmatprep.mubr.msk.bf16.mxu1 %vm98_vm0, %v422_v4  ;;  %v428_v11 = vld [vmem:[%s558_s0 + $0x38] sm:$0xff]  }
   0x7   :  { %391 = vmatpush3.bf16.msra.mxu0 %v419_v1  ;;  %414 = vmatpush3.bf16.msra.mxu1 %v419_v1 }
   0x8   :  { %416 = vmatprep.subr.msk.bf16.mxu0 %vm123_vm1, %v420_v2  ;;  %417 = vmatprep.subr.msk.bf16.mxu1 %vm123_vm1, %v420_v2 }
   0xb   :  { %393 = vmatpush3.bf16.msra.mxu0 %v125_v5  ;;  %415 = vmatpush3.bf16.msra.mxu1 %v125_v5 }
   0xe   :  { %395 = vmatmul.mubr.msk.bf16.vlgmr.msra.gmra.mrb[0].mxu0 %vm98_vm0, %v423_v6  ;;  %403 = vmatmul.mubr.msk.bf16.vlgmr.msra.gmra.mrb[0].mxu1 %vm98_vm0, %v424_v7 }
   0xf   :  { %398 = vmatprep.mubr.msk.bf16.mxu0 %vm98_vm0, %v425_v8  ;;  %406 = vmatprep.mubr.msk.bf16.mxu1 %vm98_vm0, %v426_v9 }
  0x16   :  { %399 = vmatmul.mubr.msk.bf16.gmra.mrb[4].mxu0 %vm98_vm0, %v427_v10  ;;  %407 = vmatmul.mubr.msk.bf16.gmra.mrb[4].mxu1 %vm98_vm0, %v428_v11 }
  0xe1   :  { %v396_v13 = vpop.f32.mrb[0].mxu0  ;;  %v404_v14 = vpop.f32.mrb[0].mxu1 }
  0xe2   :  { %v170_v15 = vadd.f32 %v396_v13, %v325_v12  ;;  %v202_v16 = vadd.f32 %v404_v14, %v325_v12  ;;  %v161_v17 = vpop.f32.mrb[1].mxu0  ;;  %v193_v18 = vpop.f32.mrb[1].mxu1 }
  0xe3   :  { %v162_v19 = vadd.f32 %v325_v12, %v161_v17  ;;  %v194_v20 = vadd.f32 %v325_v12, %v193_v18  ;;  %v397_v21 = vpop.f32.mrb[2].mxu0  ;;  %v405_v22 = vpop.f32.mrb[2].mxu1 }
  0xe4   :  { %v226_v23 = vmax.f32 %v170_v15, 0.0  ;;  %v234_v24 = vmax.f32 %v202_v16, 0.0  ;;  %v173_v25 = vadd.f32 %v397_v21, %v325_v12  ;;  %v205_v26 = vadd.f32 %v405_v22, %v325_v12  ;;  %v164_v27 = vpop.f32.mrb[3].mxu0  ;;  %v196_v28 = vpop.f32.mrb[3].mxu1 }
  0xe5   :  { %v224_v29 = vmax.f32 %v162_v19, 0.0  ;;  %v232_v30 = vmax.f32 %v194_v20, 0.0  ;;  %v165_v31 = vadd.f32 %v325_v12, %v164_v27  ;;  %v197_v32 = vadd.f32 %v325_v12, %v196_v28 }
  0xe6   :  { %v363_v33 = vpack.c.bf16 %v226_v23, %v226_v23  ;;  %v371_v34 = vpack.c.bf16 %v234_v24, %v234_v24  ;;  %v227_v35 = vmax.f32 %v173_v25, 0.0  ;;  %v235_v36 = vmax.f32 %v205_v26, 0.0 }
  0xe7   :  { %v361_v37 = vpack.c.bf16 %v224_v29, %v224_v29  ;;  %v369_v38 = vpack.c.bf16 %v232_v30, %v232_v30  ;;  %v225_v39 = vmax.f32 %v165_v31, 0.0  ;;  %v233_v40 = vmax.f32 %v197_v32, 0.0 }
  0xe8   :  { %307 = vst.msk [vmem:[%s560_s3 + $0x8] sm:$0xf] %vm304_vm2, %v363_v33  ;;  %315 = vst.msk [vmem:[%s560_s3 + $0x28] sm:$0xf] %vm304_vm2, %v371_v34  ;;  %v364_v41 = vpack.c.bf16 %v227_v35, %v227_v35  ;;  %v372_v42 = vpack.c.bf16 %v235_v36, %v235_v36 }
  0xe9   :  { %305 = vst.msk [vmem:[%s560_s3] sm:$0xf] %vm304_vm2, %v361_v37  ;;  %313 = vst.msk [vmem:[%s560_s3 + $0x20] sm:$0xf] %vm304_vm2, %v369_v38  ;;  %v362_v43 = vpack.c.bf16 %v225_v39, %v225_v39  ;;  %v370_v44 = vpack.c.bf16 %v233_v40, %v233_v40  ;;  %v400_v45 = vpop.f32.mrb[4].mxu0  ;;  %v408_v46 = vpop.f32.mrb[4].mxu1 }
  0xea   :  { %308 = vst.msk [vmem:[%s560_s3 + $0xc] sm:$0xf] %vm304_vm2, %v364_v41  ;;  %316 = vst.msk [vmem:[%s560_s3 + $0x2c] sm:$0xf] %vm304_vm2, %v372_v42  ;;  %v186_v47 = vadd.f32 %v400_v45, %v325_v12  ;;  %v218_v48 = vadd.f32 %v408_v46, %v325_v12  ;;  %v177_v49 = vpop.f32.mrb[5].mxu0  ;;  %v209_v50 = vpop.f32.mrb[5].mxu1 }
  0xeb   :  { %306 = vst.msk [vmem:[%s560_s3 + $0x4] sm:$0xf] %vm304_vm2, %v362_v43  ;;  %314 = vst.msk [vmem:[%s560_s3 + $0x24] sm:$0xf] %vm304_vm2, %v370_v44  ;;  %v178_v51 = vadd.f32 %v325_v12, %v177_v49  ;;  %v210_v52 = vadd.f32 %v325_v12, %v209_v50  ;;  %v401_v53 = vpop.f32.mrb[6].mxu0  ;;  %v409_v54 = vpop.f32.mrb[6].mxu1 }
  0xec   :  { %v230_v55 = vmax.f32 %v186_v47, 0.0  ;;  %v238_v56 = vmax.f32 %v218_v48, 0.0  ;;  %v189_v57 = vadd.f32 %v401_v53, %v325_v12  ;;  %v221_v58 = vadd.f32 %v409_v54, %v325_v12  ;;  %v180_v59 = vpop.f32.mrb[7].mxu0  ;;  %v212_v60 = vpop.f32.mrb[7].mxu1 }
  0xed   :  { %v228_v61 = vmax.f32 %v178_v51, 0.0  ;;  %v236_v62 = vmax.f32 %v210_v52, 0.0  ;;  %v181_v63 = vadd.f32 %v325_v12, %v180_v59  ;;  %v213_v0 = vadd.f32 %v325_v12, %v212_v60 }
  0xee   :  { %v367_v1 = vpack.c.bf16 %v230_v55, %v230_v55  ;;  %v375_v2 = vpack.c.bf16 %v238_v56, %v238_v56  ;;  %v231_v3 = vmax.f32 %v189_v57, 0.0  ;;  %v239_v4 = vmax.f32 %v221_v58, 0.0 }
  0xef   :  { %v365_v5 = vpack.c.bf16 %v228_v61, %v228_v61  ;;  %v373_v6 = vpack.c.bf16 %v236_v62, %v236_v62  ;;  %v229_v7 = vmax.f32 %v181_v63, 0.0  ;;  %v237_v8 = vmax.f32 %v213_v0, 0.0 }
  0xf0   :  { %311 = vst.msk [vmem:[%s560_s3 + $0x18] sm:$0xf] %vm304_vm2, %v367_v1  ;;  %319 = vst.msk [vmem:[%s560_s3 + $0x38] sm:$0xf] %vm304_vm2, %v375_v2  ;;  %v368_v9 = vpack.c.bf16 %v231_v3, %v231_v3  ;;  %v376_v10 = vpack.c.bf16 %v239_v4, %v239_v4 }
  0xf1   :  { %309 = vst.msk [vmem:[%s560_s3 + $0x10] sm:$0xf] %vm304_vm2, %v365_v5  ;;  %317 = vst.msk [vmem:[%s560_s3 + $0x30] sm:$0xf] %vm304_vm2, %v373_v6  ;;  %v366_v11 = vpack.c.bf16 %v229_v7, %v229_v7  ;;  %v374_v12 = vpack.c.bf16 %v237_v8, %v237_v8 }
  0xf2   :  { %312 = vst.msk [vmem:[%s560_s3 + $0x1c] sm:$0xf] %vm304_vm2, %v368_v9  ;;  %320 = vst.msk [vmem:[%s560_s3 + $0x3c] sm:$0xf] %vm304_vm2, %v376_v10 }
  0xf3   :  { %310 = vst.msk [vmem:[%s560_s3 + $0x14] sm:$0xf] %vm304_vm2, %v366_v11  ;;  %318 = vst.msk [vmem:[%s560_s3 + $0x34] sm:$0xf] %vm304_vm2, %v374_v12 }

</bundles_post_ra>
